<compile_context>
chip_gen: v5e
topology: v5e:2x2
jax: 0.10.0
libtpu: 0.0.40
codegen_flags: <defaults>
</compile_context>

<pallas_src>
import jax
import jax.numpy as jnp
from jax.experimental import pallas as pl
from jax.experimental.pallas import tpu as pltpu


def encoder_kernel(x_ref, we_ref, be_ref, wh_ref, bh_ref, mean_ref, logvar_ref):
    x = x_ref[...]

    # enc: Linear(in_ch, n_hidden) + ReLU  (stays in vregs / VMEM, never hits HBM)
    h = jnp.dot(x, we_ref[...], preferred_element_type=jnp.float32) + be_ref[...]
    h = jnp.maximum(h, 0.0)

    # Fused heads: one MXU pass producing [mu | sigma] columns.
    s = jnp.dot(h, wh_ref[...], preferred_element_type=jnp.float32) + bh_ref[...]

    z = mean_ref.shape[-1]
    mean_ref[...] = s[:, :z]

    # PyTorch Softplus (beta=1, threshold=20): linear above threshold.
    # The min-clamp also keeps garbage rows of a ragged last block from
    # overflowing exp() (those rows' stores are masked off anyway).
    sig = s[:, z:]
    logvar_ref[...] = jnp.where(
        sig > 20.0, sig, jnp.log1p(jnp.exp(jnp.minimum(sig, 20.0)))
    )


def fuse_head_params(w_mu, b_mu, w_sigma, b_sigma):
    """Concatenate the two head Linears into one (n_hidden, 2*z_dim) block.

    Done once at parameter-build time (not per forward call).
    """
    w_heads = jnp.concatenate([w_mu, w_sigma], axis=1)
    b_heads = jnp.concatenate(
        [b_mu.reshape(1, -1), b_sigma.reshape(1, -1)], axis=1
    )
    return w_heads, b_heads


def _round_up(x, m):
    return ((x + m - 1) // m) * m


def encoder_forward(x, w_enc, b_enc, w_heads, b_heads, *, block_b=1024):
    B, in_ch = x.shape
    n_hidden = w_enc.shape[1]
    two_z = w_heads.shape[1]
    z_dim = two_z // 2

    # --- Batch tiling --------------------------------------------------------
    # Large batches: 1024-row tiles (few grid steps, HBM-roofline friendly).
    # Small/medium batches: split into two blocks so the "parallel" grid axis
    # can shard across both v7x TensorCores (no effect on v5e/v6e).
    if B > block_b:
        bb = block_b
    else:
        bb = max(8, _round_up((B + 1) // 2, 8))
    n_blocks = pl.cdiv(B, bb)  # ragged last block handled by Pallas masking

    # --- Scoped-VMEM budget (v5e defaults to only 16 MiB) --------------------
    f32 = 4
    vmem_est = (
        2 * bb * in_ch * f32            # x tile, double-buffered
        + 2 * 2 * bb * z_dim * f32      # mean + logvar tiles, double-buffered
        + in_ch * n_hidden * f32        # resident enc weights
        + n_hidden * two_z * f32        # resident fused head weights
        + (n_hidden + two_z) * f32      # biases
        + bb * n_hidden * f32           # hidden-activation working set
    )
    vmem_limit = int(min(64 << 20, max(32 << 20, 2 * vmem_est + (4 << 20))))

    mean, logvar = pl.pallas_call(
        encoder_kernel,
        out_shape=(
            jax.ShapeDtypeStruct((B, z_dim), jnp.float32),
            jax.ShapeDtypeStruct((B, z_dim), jnp.float32),
        ),
        grid_spec=pltpu.PrefetchScalarGridSpec(
            num_scalar_prefetch=0,
            grid=(n_blocks,),
            in_specs=[
                pl.BlockSpec((bb, in_ch), lambda i: (i, 0)),        # x tile (pipelined)
                pl.BlockSpec((in_ch, n_hidden), lambda i: (0, 0)),  # weights stay resident
                pl.BlockSpec((1, n_hidden), lambda i: (0, 0)),
                pl.BlockSpec((n_hidden, two_z), lambda i: (0, 0)),
                pl.BlockSpec((1, two_z), lambda i: (0, 0)),
            ],
            out_specs=[
                pl.BlockSpec((bb, z_dim), lambda i: (i, 0)),
                pl.BlockSpec((bb, z_dim), lambda i: (i, 0)),
            ],
        ),
        compiler_params=pltpu.CompilerParams(
            dimension_semantics=("parallel",),
            vmem_limit_bytes=vmem_limit,
        ),
    )(x, w_enc, b_enc, w_heads, b_heads)

    return mean, logvar


def init_params(key, in_ch, n_hidden, z_dim):
    """Deterministic init mimicking nn.Linear's U(-1/sqrt(fan_in), +1/sqrt(fan_in))."""
    ks = jax.random.split(key, 6)

    def linear(kw, kb, fan_in, fan_out):
        bound = 1.0 / jnp.sqrt(fan_in)
        w = jax.random.uniform(kw, (fan_in, fan_out), jnp.float32, -bound, bound)
        b = jax.random.uniform(kb, (1, fan_out), jnp.float32, -bound, bound)
        return w, b

    w_enc, b_enc = linear(ks[0], ks[1], in_ch, n_hidden)
    w_mu, b_mu = linear(ks[2], ks[3], n_hidden, z_dim)
    w_sigma, b_sigma = linear(ks[4], ks[5], n_hidden, z_dim)
    return w_enc, b_enc, w_mu, b_mu, w_sigma, b_sigma


if __name__ == "__main__":
    B, in_ch, n_hidden, z_dim = 8, 32, 64, 16

    key = jax.random.PRNGKey(0)
    kx, kp = jax.random.split(key)
    x = jax.random.normal(kx, (B, in_ch), jnp.float32)
    w_enc, b_enc, w_mu, b_mu, w_sigma, b_sigma = init_params(kp, in_ch, n_hidden, z_dim)

    # Head fusion happens once, outside the per-call forward path.
    w_heads, b_heads = fuse_head_params(w_mu, b_mu, w_sigma, b_sigma)

    mean, logvar = jax.jit(encoder_forward)(x, w_enc, b_enc, w_heads, b_heads)
    jax.block_until_ready((mean, logvar))

    # Cross-check against a pure-JAX reference of the same forward pass.
    h_ref = jnp.maximum(x @ w_enc + b_enc, 0.0)
    mean_ref = h_ref @ w_mu + b_mu
    s_ref = h_ref @ w_sigma + b_sigma
    logvar_ref = jnp.where(
        s_ref > 20.0, s_ref, jnp.log1p(jnp.exp(jnp.minimum(s_ref, 20.0)))
    )

    assert mean.shape == (B, z_dim) and logvar.shape == (B, z_dim)
    assert jnp.allclose(mean, mean_ref, atol=1e-5, rtol=1e-5)
    assert jnp.allclose(logvar, logvar_ref, atol=1e-5, rtol=1e-5)

    print("KERNEL_OK")
</pallas_src>

<mosaic_0001>
module attributes {stable_mosaic.version = 11 : i64} {
  func.func @encoder_kernel(%arg0: i32, %arg1: memref<8x32xf32, #tpu.memory_space<vmem>>, %arg2: memref<32x64xf32, #tpu.memory_space<vmem>>, %arg3: memref<1x64xf32, #tpu.memory_space<vmem>>, %arg4: memref<64x32xf32, #tpu.memory_space<vmem>>, %arg5: memref<1x32xf32, #tpu.memory_space<vmem>>, %arg6: memref<8x16xf32, #tpu.memory_space<vmem>>, %arg7: memref<8x16xf32, #tpu.memory_space<vmem>>) attributes {dimension_semantics = [#tpu.dimension_semantics<parallel>], iteration_bounds = array<i64: 1>, scalar_prefetch = 0 : i64, scratch_operands = 0 : i64, tpu.core_type = #tpu.core_type<tc>, window_params = [{transform_indices = @transform_0, window_bounds = array<i64: 8, 32>}, {pipeline_mode = #tpu.pipeline_mode<synchronous>, transform_indices = @transform_1, window_bounds = array<i64: 32, 64>}, {pipeline_mode = #tpu.pipeline_mode<synchronous>, transform_indices = @transform_2, window_bounds = array<i64: 1, 64>}, {pipeline_mode = #tpu.pipeline_mode<synchronous>, transform_indices = @transform_3, window_bounds = array<i64: 64, 32>}, {pipeline_mode = #tpu.pipeline_mode<synchronous>, transform_indices = @transform_4, window_bounds = array<i64: 1, 32>}, {transform_indices = @transform_5, window_bounds = array<i64: 8, 16>}, {transform_indices = @transform_6, window_bounds = array<i64: 8, 16>}]} {
    %c0 = arith.constant 0 : index
    %c0_0 = arith.constant 0 : index
    %0 = vector.load %arg1[%c0, %c0_0] : memref<8x32xf32, #tpu.memory_space<vmem>>, vector<8x32xf32>
    %c0_1 = arith.constant 0 : index
    %c0_2 = arith.constant 0 : index
    %1 = vector.load %arg2[%c0_1, %c0_2] : memref<32x64xf32, #tpu.memory_space<vmem>>, vector<32x64xf32>
    %cst = arith.constant dense<0.000000e+00> : vector<8x64xf32>
    %2 = tpu.matmul %0, %1, %cst {dimension_numbers = #tpu.dot_dimension_numbers<[1], [0], [0], [1], [0, 0, 1, 1], [], []>} : vector<8x32xf32>, vector<32x64xf32>, vector<8x64xf32> -> vector<8x64xf32>
    %c0_3 = arith.constant 0 : index
    %c0_4 = arith.constant 0 : index
    %3 = vector.load %arg3[%c0_3, %c0_4] : memref<1x64xf32, #tpu.memory_space<vmem>>, vector<1x64xf32>
    %4 = vector.broadcast %3 : vector<1x64xf32> to vector<8x64xf32>
    %5 = arith.addf %2, %4 : vector<8x64xf32>
    %cst_5 = arith.constant 0.000000e+00 : f32
    %6 = vector.broadcast %cst_5 : f32 to vector<8x64xf32>
    %7 = arith.maximumf %5, %6 : vector<8x64xf32>
    %c0_6 = arith.constant 0 : index
    %c0_7 = arith.constant 0 : index
    %8 = vector.load %arg4[%c0_6, %c0_7] : memref<64x32xf32, #tpu.memory_space<vmem>>, vector<64x32xf32>
    %cst_8 = arith.constant dense<0.000000e+00> : vector<8x32xf32>
    %9 = tpu.matmul %7, %8, %cst_8 {dimension_numbers = #tpu.dot_dimension_numbers<[1], [0], [0], [1], [0, 0, 1, 1], [], []>} : vector<8x64xf32>, vector<64x32xf32>, vector<8x32xf32> -> vector<8x32xf32>
    %c0_9 = arith.constant 0 : index
    %c0_10 = arith.constant 0 : index
    %10 = vector.load %arg5[%c0_9, %c0_10] : memref<1x32xf32, #tpu.memory_space<vmem>>, vector<1x32xf32>
    %11 = vector.broadcast %10 : vector<1x32xf32> to vector<8x32xf32>
    %12 = arith.addf %9, %11 : vector<8x32xf32>
    %13 = vector.extract_strided_slice %12 {offsets = [0, 0], sizes = [8, 16], strides = [1, 1]} : vector<8x32xf32> to vector<8x16xf32>
    %c0_11 = arith.constant 0 : index
    %c0_12 = arith.constant 0 : index
    %14 = vector.load %arg6[%c0_11, %c0_12] : memref<8x16xf32, #tpu.memory_space<vmem>>, vector<8x16xf32>
    tpu.vector_store %arg6[%c0_11, %c0_12], %13 {strides = array<i32>} : memref<8x16xf32, #tpu.memory_space<vmem>>, vector<8x16xf32>,
    %15 = vector.extract_strided_slice %12 {offsets = [0, 16], sizes = [8, 16], strides = [1, 1]} : vector<8x32xf32> to vector<8x16xf32>
    %cst_13 = arith.constant 2.000000e+01 : f32
    %16 = vector.broadcast %cst_13 : f32 to vector<8x16xf32>
    %17 = arith.cmpf ogt, %15, %16 : vector<8x16xf32>
    %cst_14 = arith.constant 2.000000e+01 : f32
    %18 = vector.broadcast %cst_14 : f32 to vector<8x16xf32>
    %19 = arith.minimumf %15, %18 : vector<8x16xf32>
    %20 = math.exp %19 : vector<8x16xf32>
    %21 = math.log1p %20 : vector<8x16xf32>
    %22 = arith.select %17, %15, %21 : vector<8x16xi1>, vector<8x16xf32>
    %c0_15 = arith.constant 0 : index
    %c0_16 = arith.constant 0 : index
    %23 = vector.load %arg7[%c0_15, %c0_16] : memref<8x16xf32, #tpu.memory_space<vmem>>, vector<8x16xf32>
    tpu.vector_store %arg7[%c0_15, %c0_16], %22 {strides = array<i32>} : memref<8x16xf32, #tpu.memory_space<vmem>>, vector<8x16xf32>,
    return
  }
  func.func @transform_0(%arg0: i32) -> (i32, i32) {
    %c0_i32 = arith.constant 0 : i32
    %c0_i32_0 = arith.constant 0 : i32
    return %arg0, %c0_i32 : i32, i32
  }
  func.func @transform_1(%arg0: i32) -> (i32, i32) {
    %c0_i32 = arith.constant 0 : i32
    %c0_i32_0 = arith.constant 0 : i32
    %c0_i32_1 = arith.constant 0 : i32
    return %c0_i32, %c0_i32_0 : i32, i32
  }
  func.func @transform_2(%arg0: i32) -> (i32, i32) {
    %c0_i32 = arith.constant 0 : i32
    %c0_i32_0 = arith.constant 0 : i32
    %c0_i32_1 = arith.constant 0 : i32
    return %c0_i32, %c0_i32_0 : i32, i32
  }
  func.func @transform_3(%arg0: i32) -> (i32, i32) {
    %c0_i32 = arith.constant 0 : i32
    %c0_i32_0 = arith.constant 0 : i32
    %c0_i32_1 = arith.constant 0 : i32
    return %c0_i32, %c0_i32_0 : i32, i32
  }
  func.func @transform_4(%arg0: i32) -> (i32, i32) {
    %c0_i32 = arith.constant 0 : i32
    %c0_i32_0 = arith.constant 0 : i32
    %c0_i32_1 = arith.constant 0 : i32
    return %c0_i32, %c0_i32_0 : i32, i32
  }
  func.func @transform_5(%arg0: i32) -> (i32, i32) {
    %c0_i32 = arith.constant 0 : i32
    %c0_i32_0 = arith.constant 0 : i32
    return %arg0, %c0_i32 : i32, i32
  }
  func.func @transform_6(%arg0: i32) -> (i32, i32) {
    %c0_i32 = arith.constant 0 : i32
    %c0_i32_0 = arith.constant 0 : i32
    return %arg0, %c0_i32 : i32, i32
  }
}

</mosaic_0001>

<bundles_post_ra>
// kernel: encoder_forward.1
= control target key start
LH: loop header
LB: loop body
LE: loop exit
PB: predicated region body
PF: predicated region fallthrough
CT: control target
= control target key end

     0   :  { %12 = vsyncpa [#allocation3], 0  ;;  %s301_s0 = inlined_call_operand.vmem [shape: f32[8,32], index: 0, kind: input, shape index: {}]   ;;  %s302_s1 = inlined_call_operand.vmem [shape: f32[32,64], index: 1, kind: input, shape index: {}]   ;;  %s303_s2 = inlined_call_operand.vmem [shape: f32[1,64], index: 2, kind: input, shape index: {}]   ;;  %s304_s3 = inlined_call_operand.vmem [shape: f32[64,32], index: 3, kind: input, shape index: {}]   ;;  %s305_s4 = inlined_call_operand.vmem [shape: f32[1,32], index: 4, kind: input, shape index: {}]   ;;  %s306_s5 = inlined_call_operand.hbm [shape: f32[8,16], index: 5, kind: output, shape index: {0}]   ;;  %s307_s6 = inlined_call_operand.hbm [shape: f32[8,16], index: 6, kind: output, shape index: {1}]  }
   0x1   :  { %v28_v0 = vld [vmem:[%s302_s1 + $0x18] sm:$0xff]  ;;  %v27_v1 = vld [vmem:[%s302_s1 + $0x10] sm:$0xff]  ;;  %v26_v3 = vld [vmem:[%s302_s1 + $0x8] sm:$0xff] }
   0x2   :  { %49 = vmatpush.msra.mxu0 %v28_v0  ;;  %v65_v2 = vld [vmem:[%s304_s3 + $0x38] sm:$0xff]  ;;  %v64_v4 = vld [vmem:[%s304_s3 + $0x30] sm:$0xff]  ;;  %v63_v5 = vld [vmem:[%s304_s3 + $0x28] sm:$0xff] }
   0x3   :  { %82 = vmatpush.msra.mxu1 %v65_v2  ;;  %v25_v6 = vld [vmem:[%s302_s1] sm:$0xff] }
   0x4   :  { %50 = vmatpush.msra.mxu0 %v27_v1 }
   0x5   :  { %83 = vmatpush.msra.mxu1 %v64_v4 }
   0x6   :  { %13 = vsyncpa [#allocation5], 0  ;;  %51 = vmatpush.msra.mxu0 %v26_v3  ;;  %v24_v7 = vld [vmem:[%s301_s0] sm:$0xff]  ;;  %vm33_vm0 = vcmask 261120   ;;  %v61_v9 = vld [vmem:[%s304_s3 + $0x18] sm:$0xff]  ;;  %vm70_vm1 = vcmask 523264  }
   0x7   :  { %v62_v8 = vld [vmem:[%s304_s3 + $0x20] sm:$0xff]  ;;  %84 = vmatpush.msra.mxu1 %v63_v5  ;;  %v60_v10 = vld [vmem:[%s304_s3 + $0x10] sm:$0xff]  ;;  %v59_v11 = vld [vmem:[%s304_s3 + $0x8] sm:$0xff]  ;;  %vm94_vm2 = vcmask 130048   ;;  %s122_s27 = sshll.u32 %s306_s5, 4  ;;  %s212_s28 = smov [#allocation4]   ;;  %s123_s27 = int_to_ptr.hbm [resolvable:$true] %s122_s27 }
   0x8   :  { %52 = vmatpush.msra.mxu0 %v25_v6  ;;  %v58_v12 = vld [vmem:[%s304_s3] sm:$0xff]  ;;  %s210_s3 = smov [#allocation2]   ;;  %s131_s29 = sshll.u32 %s212_s28, 4  ;;  %s132_s29 = int_to_ptr.vmem [resolvable:$true] %s131_s29 }
   0x9   :  { %147 = vmatmul.msk.f32.vlgmr.msra.gmra.mxu0 %vm33_vm0, %v24_v7  ;;  %85 = vmatpush.msra.mxu1 %v62_v8  ;;  %v152_v13 = vld [vmem:[%s303_s2] ss:$0 sm:$0xff]  ;;  %s120_s2 = sshll.u32 %s210_s3, 4  ;;  %s133_s7 = sshll.u32 %s307_s6, 4  ;;  %s121_s2 = int_to_ptr.vmem [resolvable:$true] %s120_s2  ;;  %s134_s7 = int_to_ptr.hbm [resolvable:$true] %s133_s7 }
   0xa   :  { %v153_v17 = vld [vmem:[%s305_s4] ss:$0 sm:$0xff]  ;;  %s211_s4 = smov 112  }
   0xb   :  { %86 = vmatpush.msra.mxu1 %v61_v9 }
   0xd   :  { %87 = vmatpush.msra.mxu1 %v60_v10 }
   0xf   :  { %88 = vmatpush.msra.mxu1 %v59_v11 }
  0x11   :  { %89 = vmatpush.msra.mxu1 %v58_v12 }
  0x86   :  { %v54_v14 = vpop.f32.mrf.mxu0 }
  0x87   :  { %v55_v15 = vadd.f32 %v152_v13, %v54_v14 }
  0x89   :  { %v57_v16 = vmax.f32 %v55_v15, 0.0 }
  0x8b   :  { %148 = vmatmul.msk.f32.vlgmr.msra.gmra.mxu1 %vm70_vm1, %v57_v16 }
 0x108   :  { %v91_v18 = vpop.f32.mrf.mxu1 }
 0x109   :  { %v92_v19 = vadd.f32 %v153_v17, %v91_v18 }
 0x10b   :  { %v97_v20 = vmin.f32 %v92_v19, 20.0  ;;  %95 = vst.msk [vmem:[#allocation2] sm:$0xff] %vm94_vm2, %v92_v19  ;;  %vm96_vm4 = vcmp.gt.f32.partialorder %v92_v19, 20.0 }
 0x10c   :  { %125 = dma.vmem_to_hbm [thread:$0]  %s121_s2, 128, %s123_s27, [#allocation3]  }
 0x10d   :  { %v98_v21 = vmul.f32 1.442695, %v97_v20 }
 0x10f   :  { %154 = vpow2.f32 %v98_v21 }
 0x115   :  { %v155_v22 = vpop.eup %154 }
 0x116   :  { %v100_v23 = vadd.f32 1.0, %v155_v22  ;;  %v103_v24 = vmul.f32 -0.5, %v155_v22  ;;  %v106_v26 = vand.u32 2147483647, %v155_v22 }
 0x118   :  { %156 = vlog2.f32 %v100_v23  ;;  %v104_v25 = vadd.f32 1.0, %v103_v24  ;;  %vm107_vm3 = vcmp.lt.f32.partialorder %v106_v26, 0.0004427343 }
 0x11a   :  { %v105_v29 = vmul.f32 %v155_v22, %v104_v25 }
 0x11e   :  { %v157_v27 = vpop.eup %156 }
 0x11f   :  { %v102_v28 = vmul.f32 0.6931472, %v157_v27 }
 0x121   :  { %v108_v30 = vsel %vm107_vm3, %v105_v29, %v102_v28 }
 0x122   :  { %v109_v31 = vsel %vm96_vm4, %v92_v19, %v108_v30 }
 0x123   :  { %111 = vrot.lane.b32.xlu0 %v109_v31, %s211_s4 }
 0x195   :  { %v112_v32 = vpop.permute.xlu0 %111 }
 0x196   :  { %114 = vst.msk [vmem:[#allocation4] sm:$0xff] %vm94_vm2, %v112_v32 }
 0x197   :  { %136 = dma.vmem_to_hbm [thread:$0]  %s132_s29, 128, %s134_s7, [#allocation5]  }
 0x198   :  { %206 = dma.done.wait [#allocation3], 128  }
 0x199   :  { %207 = vsyncadd [#allocation3], 4294967168 }
 0x19a   :  { %208 = dma.done.wait [#allocation5], 128  }
 0x19b   :  { %209 = vsyncadd [#allocation5], 4294967168 }
 0x19c   :  { %145 = vsyncpa [#allocation3], 1 }
 0x19d   :  { %146 = vsyncpa [#allocation5], 1 }

</bundles_post_ra>
